<compile_context>
chip_gen: v7x
topology: tpu7x:2x2x1
jax: 0.10.0
libtpu: 0.0.40
codegen_flags: <defaults>
</compile_context>

<pallas_src>
import jax
import jax.numpy as jnp
from jax.experimental import pallas as pl
from jax.experimental.pallas import tpu as pltpu

EPS = 1e-5
SUBLANE = 8


def _round_up(x, m):
    return ((x + m - 1) // m) * m


def _prenorm_kernel(x_ref, w_ref, b_ref, o_ref):
    # x_ref: (TM, D) row tile; the feature axis is the full array extent, so
    # there are no padded lanes to mask and the row reduction is exact.
    # Garbage rows of a ragged last row-tile are purely row-local (LayerNorm is
    # per-row, matmul doesn't mix LHS rows); Pallas drops their output writes.
    x = x_ref[...].astype(jnp.float32)
    inv_d = 1.0 / x.shape[-1]

    # LayerNorm statistics in f32; centered variance avoids E[x^2]-E[x]^2
    # cancellation. Extra VPU ops are free filler in the mem-bound regime.
    mean = jnp.sum(x, axis=-1, keepdims=True) * inv_d
    centered = x - mean
    var = jnp.sum(centered * centered, axis=-1, keepdims=True) * inv_d
    normed = (centered * jax.lax.rsqrt(var + EPS)).astype(w_ref.dtype)

    # fn == Linear(dim, dim) on the MXU; gamma/beta already folded into W/b.
    out = jnp.dot(normed, w_ref[...], preferred_element_type=jnp.float32)
    out = out + b_ref[...]
    o_ref[...] = out.astype(o_ref.dtype)


def prenorm_linear(x, gamma, beta, w, b, *, tile_rows=1024,
                   mxu_dtype=jnp.bfloat16, out_dtype=None):
    """x: (B, N, D) -> (B, N, D). Fused LayerNorm(dim) + Linear(dim, dim).

    mxu_dtype=jnp.float32 is the precision escape hatch (no bf16 operand cast).
    out_dtype lets bf16 models avoid an f32 output write (mem-bound win).
    """
    B, N, D = x.shape
    M = B * N
    if out_dtype is None:
        out_dtype = x.dtype

    x2 = x.reshape(M, D)  # metadata-level reshape: no extra HBM pass, no padding

    # Fold LayerNorm affine into the linear layer (one-time weight prep):
    #   (gamma*xhat + beta) @ W + b == xhat @ (gamma[:,None]*W) + (beta@W + b)
    w_f32 = w.astype(jnp.float32)
    w_f = (gamma.astype(jnp.float32)[:, None] * w_f32).astype(mxu_dtype)
    b_f = (beta.astype(jnp.float32) @ w_f32 + b.astype(jnp.float32)).reshape(1, D)

    # ---- tiling ----------------------------------------------------------
    # Big row tiles amortize the ~0.35us/step pipeline overhead, but keep >= ~4
    # grid steps so dimension_semantics=("parallel",...) can shard across both
    # v7x TensorCores even for small M.
    tile_rows = _round_up(max(int(tile_rows), SUBLANE), SUBLANE)
    step_target = _round_up(pl.cdiv(M, 4), SUBLANE)
    tile_rows = max(SUBLANE, min(tile_rows, step_target))

    # Column-tile W's output dim once a single W copy exceeds ~8 MiB; otherwise
    # keep W fully resident (its block index is constant, so it is not re-DMAed
    # across row steps).
    mxu_itemsize = jnp.dtype(mxu_dtype).itemsize
    if D * D * mxu_itemsize <= 8 * 1024 * 1024:
        tile_n = D
    else:
        tile_n = min(D, 1024)

    # ---- VMEM budget -------------------------------------------------------
    try:
        vmem_cap = int(pltpu.get_tpu_info().vmem_capacity_bytes)
    except Exception:
        vmem_cap = 64 * 1024 * 1024  # conservative fallback (v7x per-TC size)
    vmem_ceiling = min(96 * 1024 * 1024, vmem_cap - 24 * 1024 * 1024)

    x_it = jnp.dtype(x.dtype).itemsize
    o_it = jnp.dtype(out_dtype).itemsize

    def est_bytes(tr):
        return (2 * tr * D * x_it                 # double-buffered x tile
                + 2 * tr * tile_n * o_it          # double-buffered out tile
                + 2 * D * tile_n * mxu_itemsize   # W buffers
                + 2 * tile_n * 4                  # bias buffers
                + (2 << 20))                      # compiler-scratch headroom

    while est_bytes(tile_rows) > vmem_ceiling and tile_rows > SUBLANE:
        tile_rows = max(SUBLANE, _round_up(tile_rows // 2, SUBLANE))

    vmem_limit = int(min(vmem_ceiling, max(16 * 1024 * 1024, est_bytes(tile_rows))))

    grid = (pl.cdiv(M, tile_rows), pl.cdiv(D, tile_n))

    out2 = pl.pallas_call(
        _prenorm_kernel,
        out_shape=jax.ShapeDtypeStruct((M, D), out_dtype),
        grid_spec=pltpu.PrefetchScalarGridSpec(
            num_scalar_prefetch=0,
            grid=grid,
            in_specs=[
                # x rows; feature axis = full array extent (LayerNorm needs it).
                pl.BlockSpec((tile_rows, D), lambda i, j: (i, 0)),
                # folded W (bf16 by default), column-tiled for very large D.
                pl.BlockSpec((D, tile_n), lambda i, j: (0, j)),
                # folded bias (f32).
                pl.BlockSpec((1, tile_n), lambda i, j: (0, j)),
            ],
            out_specs=pl.BlockSpec((tile_rows, tile_n), lambda i, j: (i, j)),
        ),
        compiler_params=pltpu.CompilerParams(
            dimension_semantics=("parallel", "arbitrary"),
            vmem_limit_bytes=vmem_limit,
        ),
    )(x2, w_f, b_f)

    return out2.reshape(B, N, D)


def _reference(x, gamma, beta, w, b):
    xf = x.astype(jnp.float32)
    mean = jnp.mean(xf, axis=-1, keepdims=True)
    var = jnp.mean((xf - mean) ** 2, axis=-1, keepdims=True)
    normed = (xf - mean) * jax.lax.rsqrt(var + EPS) * gamma + beta
    return (normed @ w + b).astype(x.dtype)


if __name__ == "__main__":
    B, N, D = 2, 8, 32  # batch=2, seq=8, hidden=32

    key = jax.random.PRNGKey(0)
    kx, kg, kb, kw, kbias = jax.random.split(key, 5)

    x = jax.random.normal(kx, (B, N, D), dtype=jnp.float32)
    gamma = 1.0 + 0.1 * jax.random.normal(kg, (D,), dtype=jnp.float32)
    beta = 0.1 * jax.random.normal(kb, (D,), dtype=jnp.float32)
    w = jax.random.normal(kw, (D, D), dtype=jnp.float32) / jnp.sqrt(D)
    b = 0.1 * jax.random.normal(kbias, (D,), dtype=jnp.float32)

    out = prenorm_linear(x, gamma, beta, w, b)
    out = jax.block_until_ready(out)

    ref = _reference(x, gamma, beta, w, b)
    assert out.shape == (B, N, D), out.shape
    # bf16 MXU operands with f32 accumulation -> relaxed tolerance vs f32 ref.
    assert jnp.allclose(out, ref, atol=3e-2, rtol=3e-2), float(
        jnp.max(jnp.abs(out - ref))
    )

    print("KERNEL_OK")
</pallas_src>

<mosaic_0001>
module attributes {stable_mosaic.version = 11 : i64} {
  func.func @_prenorm_kernel(%arg0: i32, %arg1: i32, %arg2: memref<8x32xf32, #tpu.memory_space<vmem>>, %arg3: memref<32x32xbf16, #tpu.memory_space<vmem>>, %arg4: memref<1x32xf32, #tpu.memory_space<vmem>>, %arg5: memref<8x32xf32, #tpu.memory_space<vmem>>) attributes {dimension_semantics = [#tpu.dimension_semantics<parallel>, #tpu.dimension_semantics<arbitrary>], iteration_bounds = array<i64: 2, 1>, scalar_prefetch = 0 : i64, scratch_operands = 0 : i64, tpu.core_type = #tpu.core_type<tc>, window_params = [{transform_indices = @transform_0, window_bounds = array<i64: 8, 32>}, {transform_indices = @transform_1, window_bounds = array<i64: 32, 32>}, {transform_indices = @transform_2, window_bounds = array<i64: 1, 32>}, {transform_indices = @transform_3, window_bounds = array<i64: 8, 32>}]} {
    %c0 = arith.constant 0 : index
    %c0_0 = arith.constant 0 : index
    %0 = vector.load %arg2[%c0, %c0_0] : memref<8x32xf32, #tpu.memory_space<vmem>>, vector<8x32xf32>
    %cst = arith.constant dense<0.000000e+00> : vector<8xf32>
    %1 = vector.multi_reduction <add>, %0, %cst [1] : vector<8x32xf32> to vector<8xf32>
    %2 = vector.shape_cast %1 : vector<8xf32> to vector<8x1xf32>
    %cst_1 = arith.constant 3.125000e-02 : f32
    %3 = vector.broadcast %cst_1 : f32 to vector<8x1xf32>
    %4 = arith.mulf %2, %3 : vector<8x1xf32>
    %5 = vector.broadcast %4 : vector<8x1xf32> to vector<8x32xf32>
    %6 = arith.subf %0, %5 : vector<8x32xf32>
    %7 = arith.mulf %6, %6 : vector<8x32xf32>
    %cst_2 = arith.constant dense<0.000000e+00> : vector<8xf32>
    %8 = vector.multi_reduction <add>, %7, %cst_2 [1] : vector<8x32xf32> to vector<8xf32>
    %9 = vector.shape_cast %8 : vector<8xf32> to vector<8x1xf32>
    %cst_3 = arith.constant 3.125000e-02 : f32
    %10 = vector.broadcast %cst_3 : f32 to vector<8x1xf32>
    %11 = arith.mulf %9, %10 : vector<8x1xf32>
    %cst_4 = arith.constant 9.99999974E-6 : f32
    %12 = vector.broadcast %cst_4 : f32 to vector<8x1xf32>
    %13 = arith.addf %11, %12 : vector<8x1xf32>
    %14 = math.rsqrt %13 : vector<8x1xf32>
    %15 = vector.broadcast %14 : vector<8x1xf32> to vector<8x32xf32>
    %16 = arith.mulf %6, %15 : vector<8x32xf32>
    %17 = arith.truncf %16 : vector<8x32xf32> to vector<8x32xbf16>
    %c0_5 = arith.constant 0 : index
    %c0_6 = arith.constant 0 : index
    %18 = vector.load %arg3[%c0_5, %c0_6] : memref<32x32xbf16, #tpu.memory_space<vmem>>, vector<32x32xbf16>
    %cst_7 = arith.constant dense<0.000000e+00> : vector<8x32xf32>
    %19 = tpu.matmul %17, %18, %cst_7 {dimension_numbers = #tpu.dot_dimension_numbers<[1], [0], [0], [1], [0, 0, 1, 1], [], []>} : vector<8x32xbf16>, vector<32x32xbf16>, vector<8x32xf32> -> vector<8x32xf32>
    %c0_8 = arith.constant 0 : index
    %c0_9 = arith.constant 0 : index
    %20 = vector.load %arg4[%c0_8, %c0_9] : memref<1x32xf32, #tpu.memory_space<vmem>>, vector<1x32xf32>
    %21 = vector.broadcast %20 : vector<1x32xf32> to vector<8x32xf32>
    %22 = arith.addf %19, %21 : vector<8x32xf32>
    %c0_10 = arith.constant 0 : index
    %c0_11 = arith.constant 0 : index
    %23 = vector.load %arg5[%c0_10, %c0_11] : memref<8x32xf32, #tpu.memory_space<vmem>>, vector<8x32xf32>
    tpu.vector_store %arg5[%c0_10, %c0_11], %22 {strides = array<i32>} : memref<8x32xf32, #tpu.memory_space<vmem>>, vector<8x32xf32>,
    return
  }
  func.func @transform_0(%arg0: i32, %arg1: i32) -> (i32, i32) {
    %c0_i32 = arith.constant 0 : i32
    %c0_i32_0 = arith.constant 0 : i32
    return %arg0, %c0_i32 : i32, i32
  }
  func.func @transform_1(%arg0: i32, %arg1: i32) -> (i32, i32) {
    %c0_i32 = arith.constant 0 : i32
    %c0_i32_0 = arith.constant 0 : i32
    return %c0_i32, %arg1 : i32, i32
  }
  func.func @transform_2(%arg0: i32, %arg1: i32) -> (i32, i32) {
    %c0_i32 = arith.constant 0 : i32
    %c0_i32_0 = arith.constant 0 : i32
    return %c0_i32, %arg1 : i32, i32
  }
  func.func @transform_3(%arg0: i32, %arg1: i32) -> (i32, i32) {
    %c0_i32 = arith.constant 0 : i32
    return %arg0, %arg1 : i32, i32
  }
}

</mosaic_0001>

<bundles_post_ra>
// kernel: tpu_custom_call.1
= control target key start
LH: loop header
LB: loop body
LE: loop exit
PB: predicated region body
PF: predicated region fallthrough
CT: control target
= control target key end

     0   :  { %8 = vsyncpa [#allocation3], 0  ;;  %s948_s0 = inlined_call_operand.hbm [shape: f32[16,32], index: 0, kind: input, shape index: {}]   ;;  %s949_s1 = inlined_call_operand.hbm [shape: bf16[32,32], index: 1, kind: input, shape index: {}]   ;;  %s950_s2 = inlined_call_operand.vmem [shape: f32[1,32], index: 2, kind: input, shape index: {}]   ;;  %s951_s3 = inlined_call_operand.hbm [shape: f32[16,32], index: 3, kind: output, shape index: {}]  }
   0x1   :  { %10 = vsyncpa [#allocation3 + $0x1], 0 }
   0x2   :  { %11 = vsyncpa [#allocation6], 0 }
   0x3   :  { %12 = vsyncpa [#allocation4], 0 }
   0x4   :  { %14 = vsyncpa [#allocation4 + $0x1], 0  ;;  %s723_s12 = smov 0   ;;  %s725_s13 = smov 0  }
   0x5   :  { %s727_s14 = smov 0   ;;  %s729_s15 = smov 0  }
   0x6   :  { %s731_s16 = smov 0   ;;  %s733_s17 = smov 0  }
   0x7 LB: > { %s438_s18 = sadd.s32 4294967295, %s694_s17   ;;  %s439_s19 = sadd.s32 4294967294, %s694_s17   ;;  %s694_s17 = sphi %s733_s17, %s20_s17   ;;  %s690_s16 = sphi %s731_s16, %s975_s16   ;;  %s686_s15 = sphi %s729_s15, %s974_s15   ;;  %s682_s14 = sphi %s727_s14, %s973_s14   ;;  %s678_s13 = sphi %s725_s13, %s972_s13   ;;  %s674_s12 = sphi %s723_s12, %s971_s12  }
   0x8   : > { %p52_p0 = scmp.ne.s32.totalorder %s678_s13, %s674_s12  ;;  %p757_p1 = scmp.eq.s32.totalorder %s438_s18, 0 }
   0x9   : > { %p761_p2 = scmp.eq.s32.totalorder %s438_s18, 1  ;;  %p136_p3 = scmp.eq.s32.totalorder %s439_s19, 1 }
   0xa   : > { %s956_s20 = scalar_select %p757_p1, 1, 0 }
   0xb   : > { %s957_s21 = scalar_select %p761_p2, 1, 0 }
   0xc   : > { %p767_p4 = por %p757_p1, %p52_p0  ;;  %p440_p5 = scmp.ge.s32.totalorder %s694_s17, 1 }
   0xd   : > { %p772_p6 = por %p136_p3, %p52_p0  ;;  %p143_p7 = scmp.lt.s32.totalorder %s694_s17, 3 }
   0xe   : > { %s958_s22 = scalar_select %p767_p4, 1, 0 }
   0xf   : > { %s959_s23 = scalar_select %p772_p6, 1, 0 }
  0x10   : > { %p777_p8 = pnand %p440_p5, %p143_p7  ;;  %s696_s25 = smov [#allocation5]  }
  0x11   : > { %s157_s26 = sshll.u32 %s696_s25, 4  ;;  %s32_s28 = sadd.s32 1, %s690_s16  ;;  %s158_s26 = int_to_ptr.vmem [resolvable:$true] %s157_s26 }
  0x12   : > { %s960_s24 = scalar_select %p777_p8, 1, 0 }
  0x13   : > { %p477_p9 = pneg %p777_p8  ;;  %s550_s4 = scalar_lea.hbm %s949_s1, 256 }
  0x14   : > { %p551_p12 = scmp.ne.s32.totalorder %s949_s1, %s550_s4  ;;  %p557_p5 = scmp.lt.u32.totalorder %s550_s4, %s949_s1 }
  0x15   : > { %p786_p11 = pnand %p477_p9, %p757_p1 }
  0x17   : > { %p552_p13 = pneg %p786_p11 }
  0x19   : > { %p553_p0 = pnand %p552_p13, %p551_p12 }
  0x1b   : > { %p554_p3 = pneg %p553_p0 }
  0x1d   : > { %p559_p7 = pnand %p557_p5, %p554_p3 }
  0x1f   : > { %562 = shalt.err (!%p559_p7)
}
  0x20   : > { %s563_s9 = scalar_lea.vmem %s158_s26, 256  ;;  %p571_p1 = scmp.lt.s32.totalorder %s158_s26, %s158_s26 }
  0x21   : > { %p564_p9 = scmp.ne.s32.totalorder %s158_s26, %s563_s9  ;;  %p572_p4 = scmp.lt.s32.totalorder %s563_s9, %s563_s9 }
  0x23   : > { %p566_p10 = pnand %p564_p9, %p552_p13  ;;  %p573_p8 = por %p572_p4, %p571_p1 }
  0x25   : > { %p567_p6 = pneg %p566_p10 }
  0x27   : > { %p574_p2 = pnand %p573_p8, %p567_p6 }
  0x29   : > { %577 = shalt.err (!%p574_p2)
}
  0x2a   : > { %s697_s10 = smov 64   ;;  %s698_s11 = smov 4  }
  0x2b   : > { %480 = dma.hbm_to_vmem [thread:$0]  (!%p786_p11), %s949_s1, 256, %s158_s26, [#allocation6], %s697_s10, %s697_s10, %s698_s11  }
  0x2c   : > { %p34_p1 = scmp.ge.s32.totalorder %s32_s28, 2  ;;  %s39_s25 = sadd.s32 1, %s682_s14 }
  0x2d   : > { %p46_p2 = scmp.ne.s32.totalorder %s682_s14, %s678_s13  ;;  %p47_p4 = scmp.eq.s32.totalorder %s694_s17, 0 }
  0x2e   : > { %s977_s28 = smov (%p34_p1, %s32_s28), 0  ;;  %p963_p8 = scmp.ne.s32.totalorder %s957_s21, 0 }
  0x2f   : > { %p813_p6 = por %p47_p4, %p46_p2  ;;  %s36_s27 = ssub.s32 %s690_s16, %s977_s28 }
  0x30   : > { %p819_p10 = por %p963_p8, %p46_p2  ;;  %p490_p12 = scmp.lt.s32.totalorder %s694_s17, 2 }
  0x31   : > { %p37_p11 = scmp.eq.s32.totalorder %s36_s27, 0  ;;  %s177_s26 = sand.u32 1, %s682_s14  }
  0x32   : > { %s444_s4 = sshll.u32 %s177_s26, 3  ;;  %s445_s6 = sshll.u32 %s690_s16, 7 }
  0x33   : > { %s828_s5 = scalar_select %p37_p11, %s682_s14, %s39_s25  }
  0x34   : > { %s834_s9 = scalar_lea.hbm %s948_s0, %s445_s6  ;;  %s181_s21 = scalar_lea.vmem [#allocation2], %s444_s4 }
  0x35   : > { %s188_s10 = sshll.u32 %s181_s21, 4  ;;  %p840_p13 = pnand %p490_p12, %p813_p6  ;;  %s836_s10 = int_to_ptr.vmem [resolvable:$true] %s188_s10 }
  0x36   : > { %s178_s18 = scalar_lea.sflag [#allocation3], %s177_s26  ;;  %s578_s19 = scalar_lea.hbm %s834_s9, 128 }
  0x37   : > { %p579_p0 = scmp.ne.s32.totalorder %s834_s9, %s578_s19  ;;  %p580_p3 = pneg %p840_p13 }
  0x38   : > { %s583_s4 = scalar_lea.hbm %s948_s0, 256  ;;  %p584_p9 = scmp.lt.u32.totalorder %s834_s9, %s948_s0 }
  0x39   : > { %p581_p5 = pnand %p580_p3, %p579_p0  ;;  %p585_p1 = scmp.lt.u32.totalorder %s583_s4, %s578_s19 }
  0x3a   : > { %p587_p4 = scmp.lt.u32.totalorder %s578_s19, %s834_s9 }
  0x3b   : > { %p582_p7 = pneg %p581_p5  ;;  %p586_p2 = por %p585_p1, %p584_p9 }
  0x3d   : > { %p588_p6 = por %p587_p4, %p586_p2 }
  0x3f   : > { %p589_p8 = pnand %p588_p6, %p582_p7 }
  0x41   : > { %592 = shalt.err (!%p589_p8)
}
  0x42   : > { %s593_s26 = scalar_lea.vmem %s836_s10, 128  ;;  %s699_s7 = smov [#allocation2]  }
  0x43   : > { %p594_p12 = scmp.ne.s32.totalorder %s836_s10, %s593_s26  ;;  %s598_s8 = sshll.u32 %s699_s7, 4  ;;  %s599_s8 = int_to_ptr.vmem [resolvable:$false] %s598_s8 }
  0x44   : > { %s600_s21 = scalar_lea.vmem %s599_s8, 256  ;;  %p601_p5 = scmp.lt.s32.totalorder %s836_s10, %s599_s8 }
  0x45   : > { %p596_p11 = pnand %p594_p12, %p580_p3  ;;  %p602_p9 = scmp.lt.s32.totalorder %s600_s21, %s593_s26 }
  0x47   : > { %p597_p0 = pneg %p596_p11  ;;  %p603_p1 = por %p602_p9, %p601_p5 }
  0x49   : > { %p604_p2 = pnand %p603_p1, %p597_p0 }
  0x4b   : > { %607 = shalt.err (!%p604_p2)
}
  0x4c   : > { %484 = dma.hbm_to_vmem [thread:$0]  (!%p840_p13), %s834_s9, 128, %s836_s10, %s178_s18  }
  0x4d   : > { %p966_p7 = scmp.ne.s32.totalorder %s960_s24, 0 }
  0x4e   : > { %s872_s19 = sand.u32 (!%p966_p7), 1, %s678_s13   ;;  %p967_p3 = scmp.ne.s32.totalorder (!%p966_p7), %s958_s22, 0 }
  0x4f   : > { %197 = sbr.rel (%p966_p7) target bundleno = 630 (0x276), region = 32  ;;  %s447_s25 = sshll.u32 (!%p966_p7), %s872_s19, 3 }
  0x50   : > { %s200_s27 = scalar_lea.sflag (!%p966_p7), [#allocation3], %s872_s19  ;;  %s203_s4 = scalar_lea.vmem (!%p966_p7), [#allocation2], %s447_s25 }
  0x56   : > { %661 = dma.done.wait (%p967_p3), %s200_s27, 128  }
  0x57   : > { %663 = vsyncadd (%p967_p3), %s200_s27, 4294967168  ;;  %p968_p13 = scmp.ne.s32.totalorder %s956_s20, 0 }
  0x59   : > { %665 = dma.done.wait (%p968_p13), [#allocation6], 256  }
  0x5a   : > { %667 = vsyncadd (%p968_p13), [#allocation6], 4294967040  ;;  %vm238_vm0 = vcmask 261120   ;;  %v237_v0 = vld [vmem:[%s203_s4] sm:$0xff]  ;;  %v546_v7 = vld [vmem:[#allocation5] sm:$0xff]   ;;  %v700_v8 = vmov 0.0  }
  0x5b   : > { %v239_v1 = vsel %vm238_vm0, %v237_v0, 0.0  ;;  %461 = vmatprep.subr.bf16.mxu0 %v700_v8  ;;  %vm701_vm1 = vmmov 0   ;;  %v547_v9 = vld [vmem:[#allocation5 + $0x8] sm:$0xff]   ;;  %v450_v16 = vld [vmem:[%s950_s2] ss:$0 sm:$0xff]  ;;  %s455_s24 = sshll.u32 %s686_s15, 7 }
  0x5c   : > { %240 = vadd.xlane.f32.xlu0 %v239_v1  ;;  %465 = vmatprep.mubr.msk.bf16.mxu0 %vm701_vm1, %v700_v8  ;;  %s232_s9 = scalar_lea.vmem [#allocation7], %s447_s25  ;;  %s898_s29 = scalar_lea.hbm %s951_s3, %s455_s24 }
  0x5d   : > { %462 = vmatpush3.bf16.msra.mxu0 %v546_v7  ;;  %s335_s10 = sshll.u32 %s232_s9, 4  ;;  %s321_s15 = scalar_lea.sflag [#allocation4], %s872_s19  ;;  %s900_s10 = int_to_ptr.vmem [resolvable:$true] %s335_s10 }
  0x5e   : > { %463 = vmatprep.subr.bf16.mxu0 %v700_v8  ;;  %s608_s6 = scalar_lea.vmem %s900_s10, 128  ;;  %s702_s26 = smov [#allocation7]  }
  0x5f   : > { %p609_p4 = scmp.ne.s32.totalorder %s900_s10, %s608_s6  ;;  %s612_s7 = sshll.u32 %s702_s26, 4  ;;  %s613_s7 = int_to_ptr.vmem [resolvable:$false] %s612_s7 }
  0x60   : > { %s614_s8 = scalar_lea.vmem %s613_s7, 256  ;;  %p615_p12 = scmp.lt.s32.totalorder %s900_s10, %s613_s7 }
  0x61   : > { %464 = vmatpush3.bf16.msra.mxu0 %v547_v9  ;;  %p610_p6 = pnand %p609_p4, %p819_p10  ;;  %p616_p11 = scmp.lt.s32.totalorder %s614_s8, %s608_s6 }
  0x63   : > { %p611_p8 = pneg %p610_p6  ;;  %p617_p0 = por %p616_p11, %p615_p12 }
  0x65   : > { %p618_p5 = pnand %p617_p0, %p611_p8 }
  0xe9   : > { %v241_v2 = vpop.xlane.xlu0 %240 }
  0xea   : > { %v242_v3 = vmul.f32 0.03125, %v241_v2 }
  0xec   : > { %v243_v4 = vsub.f32 %v237_v0, %v242_v3 }
  0xee   : > { %v244_v5 = vmul.f32 %v243_v4, %v243_v4 }
  0xf0   : > { %v245_v6 = vsel %vm238_vm0, %v244_v5, 0.0 }
  0xf1   : > { %246 = vadd.xlane.f32.xlu0 %v245_v6 }
 0x17e   : > { %v247_v10 = vpop.xlane.xlu0 %246 }
 0x17f   : > { %v248_v11 = vmul.f32 0.03125, %v247_v10 }
 0x181   : > { %v249_v12 = vadd.f32 1e-05, %v248_v11 }
 0x183   : > { %548 = vrsqrt.f32 %v249_v12 }
 0x18d   : > { %v549_v13 = vpop.eup %548 }
 0x18e   : > { %v251_v14 = vmul.f32 %v549_v13, %v243_v4 }
 0x190   : > { %v252_v15 = vpack.c.bf16 %v251_v14, %v251_v14 }
 0x192   : > { %466 = vmatmul.mubr.msk.bf16.vlgmr.msra.gmra.mrb[0].mxu0 %vm238_vm0, %v252_v15 }
 0x265   : > { %v313_v17 = vpop.f32.mrb[0].mxu0 }
 0x266   : > { %v314_v18 = vadd.f32 %v450_v16, %v313_v17  ;;  %v467_v19 = vpop.f32.mrb[1].mxu0 }
 0x267   : > { %v316_v20 = vpop.f32.mrb[2].mxu0 }
 0x268   : > { %v468_v21 = vpop.f32.mrb[3].mxu0  ;;  %319 = vst.msk [vmem:[%s232_s9] sm:$0xff] %vm238_vm0, %v314_v18 }
 0x269   : > { %621 = shalt.err (!%p618_p5)
}
 0x26a   : > { %s622_s21 = scalar_lea.hbm %s898_s29, 128  ;;  %s626_s27 = scalar_lea.hbm %s951_s3, 256 }
 0x26b   : > { %p623_p9 = scmp.ne.s32.totalorder %s898_s29, %s622_s21  ;;  %p627_p7 = scmp.lt.u32.totalorder %s898_s29, %s951_s3 }
 0x26c   : > { %p628_p3 = scmp.lt.u32.totalorder %s626_s27, %s622_s21  ;;  %p630_p4 = scmp.lt.u32.totalorder %s622_s21, %s898_s29 }
 0x26d   : > { %p624_p1 = pnand %p623_p9, %p819_p10 }
 0x26e   : > { %p629_p13 = por %p628_p3, %p627_p7 }
 0x26f   : > { %p625_p2 = pneg %p624_p1 }
 0x270   : > { %p631_p6 = por %p630_p4, %p629_p13 }
 0x272   : > { %p632_p8 = pnand %p631_p6, %p625_p2 }
 0x274   : > { %635 = shalt.err (!%p632_p8)
}
 0x275   : > { %475 = dma.vmem_to_hbm [thread:$0]  (%p819_p10), %s900_s10, 128, %s898_s29, %s321_s15  }
 0x276 PF: > { %s347_s22 = sand.u32 1, %s674_s12   ;;  %p969_p12 = scmp.ne.s32.totalorder %s959_s23, 0 }
 0x277   : > { %p970_p11 = scmp.ge.s32.totalorder %s694_s17, 2  ;;  %s348_s24 = scalar_lea.sflag [#allocation4], %s347_s22 }
 0x279   : > { %p486_p0 = pnand %p970_p11, %p969_p12 }
 0x27b   : > { %669 = dma.done.wait (!%p486_p0), %s348_s24, 128  }
 0x27c   : > { %671 = vsyncadd (!%p486_p0), %s348_s24, 4294967168  ;;  %s20_s17 = sadd.s32 1, %s694_s17   ;;  %s971_s12 = smov %s678_s13 }
 0x27d   : > { %p17_p5 = scmp.ge.s32.totalorder %s20_s17, 4   ;;  %s972_s13 = smov %s682_s14 }
 0x27e   : > { %s973_s14 = smov %s828_s5  ;;  %s974_s15 = smov %s690_s16 }
 0x27f   : > { %s975_s16 = smov %s977_s28  ;;  %19 = sbr.rel (!%p17_p5) target bundleno = 7 (0x7), region = 85 }
 0x286   :  { %353 = vsyncpa [#allocation3], 1 }
 0x287   :  { %355 = vsyncpa [#allocation3 + $0x1], 1 }
 0x288   :  { %356 = vsyncpa [#allocation6], 1 }
 0x289   :  { %357 = vsyncpa [#allocation4], 1 }
 0x28a   :  { %359 = vsyncpa [#allocation4 + $0x1], 1 }

</bundles_post_ra>
